<compile_context>
chip_gen: v7x
topology: tpu7x:2x2x1
jax: 0.10.0
libtpu: 0.0.40
codegen_flags: <defaults>
</compile_context>

<pallas_src>
import jax
import jax.numpy as jnp
from jax import lax
from jax.experimental import pallas as pl
from jax.experimental.pallas import tpu as pltpu


# --------------------------------------------------------------------------- #
# Helpers
# --------------------------------------------------------------------------- #
def _round_up(x, m):
    return (x + m - 1) // m * m


def _vmem_budgets():
    """(tile_budget_bytes, vmem_limit_bytes) derived from the actual chip.

    v5e/v6e: 128 MiB physical VMEM -> ~88 MiB for tiles, 100 MiB scoped limit.
    v7x:      64 MiB / TensorCore  -> ~45 MiB for tiles, ~54 MiB scoped limit.
    """
    cap = 64 * 1024 * 1024  # conservative fallback (v7x per-TensorCore VMEM)
    try:
        info = pltpu.get_tpu_info()
        cap = int(getattr(info, "vmem_capacity_bytes", cap) or cap)
    except Exception:
        pass
    tile_budget = min(int(cap * 0.70), 88 * 1024 * 1024)
    vmem_limit = min(int(cap * 0.85), 100 * 1024 * 1024)
    return tile_budget, vmem_limit


_M_TILE_CANDIDATES = (512, 448, 384, 320, 256, 192, 128, 96, 64, 48, 32, 24, 16, 8)


def _pick_tile_m(batch, max_tile):
    """Sublane (batch) tile: minimize padding waste, multiple of 8."""
    max_tile = max(8, max_tile)
    full = _round_up(batch, 8)
    if full <= max_tile:
        return full
    cands = [t for t in _M_TILE_CANDIDATES if t <= max_tile]
    return min(cands, key=lambda t: (_round_up(batch, t) - batch, -t))


def _pick_tile(dim, max_tile, align=256):
    """Lane tile (N or K): whole 128-padded dim if it fits, else a multiple of
    `align` (256: fills the 2x256x256 MXU on v6e/v7x) minimizing padding."""
    max_tile = max(128, max_tile)
    full = _round_up(dim, 128)
    if full <= max_tile:
        return full
    step = align if max_tile >= align else 128
    cands = set(range(step, max_tile + 1, step))
    cands.add((max_tile // 128) * 128)
    return min(cands, key=lambda t: (_round_up(dim, t) - dim, -t))


# --------------------------------------------------------------------------- #
# Kernels
# --------------------------------------------------------------------------- #
def _dot_nt_f32(x, w):
    # (tm, tk) x (tn, tk)^T -> (tm, tn); MXU matmul with f32 accumulation.
    return lax.dot_general(
        x, w, dimension_numbers=(((1,), (1,)), ((), ())),
        preferred_element_type=jnp.float32)


def _epilogue(acc_f32, s_ref, b_ref, out_dtype):
    # Folded BatchNorm: y = acc * (gamma/sqrt(var+eps)) + ((bias-mean)*scale + beta)
    y = acc_f32 * s_ref[...] + b_ref[...]
    y = jnp.where(y >= 0.0, y, 0.2 * y)        # LeakyReLU(0.2); Dropout = identity (eval)
    return y.astype(out_dtype)


def _fc_bn_lrelu_single_k_kernel(x_ref, w_ref, s_ref, b_ref, o_ref):
    """K fits in one tile: no accumulator scratch, no K grid axis."""
    acc = _dot_nt_f32(x_ref[...], w_ref[...])
    o_ref[...] = _epilogue(acc, s_ref, b_ref, o_ref.dtype)


def _fc_bn_lrelu_multi_k_f32out_kernel(x_ref, w_ref, s_ref, b_ref, o_ref):
    """K split across grid axis 2; f32 output block doubles as the accumulator."""
    k = pl.program_id(2)
    part = _dot_nt_f32(x_ref[...], w_ref[...])

    @pl.when(k == 0)
    def _():
        o_ref[...] = part

    @pl.when(k > 0)
    def _():
        o_ref[...] += part

    @pl.when(k == pl.num_programs(2) - 1)
    def _():
        o_ref[...] = _epilogue(o_ref[...], s_ref, b_ref, o_ref.dtype)


def _fc_bn_lrelu_multi_k_scratch_kernel(x_ref, w_ref, s_ref, b_ref, o_ref, acc_ref):
    """K split across grid axis 2; narrow output dtype -> f32 VMEM accumulator."""
    k = pl.program_id(2)

    @pl.when(k == 0)
    def _():
        acc_ref[...] = jnp.zeros_like(acc_ref)

    acc_ref[...] += _dot_nt_f32(x_ref[...], w_ref[...])

    @pl.when(k == pl.num_programs(2) - 1)
    def _():
        o_ref[...] = _epilogue(acc_ref[...], s_ref, b_ref, o_ref.dtype)


# --------------------------------------------------------------------------- #
# Wrapper
# --------------------------------------------------------------------------- #
def prepare_fc_bn_leaky_relu_drop(weight, bias, gamma, beta, running_mean,
                                  running_var, *, eps=1e-5,
                                  compute_dtype=jnp.bfloat16,
                                  tm=512, tn=512, tk=2048):
    """One-time parameter prep (reusable across forward calls).

    Folds BatchNorm running stats into a per-channel f32 (scale, bias) pair
    applied in the kernel epilogue, and pads/casts the weight ONCE (original
    (out_dim, in_dim) layout, no transpose, no per-call rescaled copy in HBM).
    """
    N, K = weight.shape
    f32 = jnp.float32

    inv_std = 1.0 / jnp.sqrt(running_var.astype(f32) + eps)          # (N,)
    scale = gamma.astype(f32) * inv_std                              # (N,)
    b_eff = (bias.astype(f32) - running_mean.astype(f32)) * scale + beta.astype(f32)

    tile_budget, vmem_limit = _vmem_budgets()
    in_isz = jnp.dtype(compute_dtype).itemsize
    out_isz = 4  # worst case (f32 output)

    tm_cap = max(8, min(tm, 512))
    tn_e = _pick_tile(N, max(128, min(tn, 512)), align=256)

    # Remaining VMEM after double-buffered output tiles, the (worst-case) f32
    # accumulator scratch and the tiny resident scale/bias blocks bounds how
    # much K each (double-buffered) x / W tile may carry.
    avail = (tile_budget
             - 2 * tm_cap * tn_e * out_isz
             - tm_cap * tn_e * 4
             - 2 * 2 * tn_e * 4)
    tk_cap = max(128, (avail // max(1, 2 * (tm_cap + tn_e) * in_isz)) // 128 * 128)
    tk_e = _pick_tile(K, min(max(128, tk), tk_cap), align=256)

    Np = _round_up(N, tn_e)
    Kp = _round_up(K, tk_e)

    wp = jnp.pad(weight, ((0, Np - N), (0, Kp - K))).astype(compute_dtype)   # (Np, Kp)
    scale_p = jnp.pad(scale, (0, Np - N)).reshape(1, Np)                     # f32
    bias_p = jnp.pad(b_eff, (0, Np - N)).reshape(1, Np)                      # f32

    return dict(wp=wp, scale_p=scale_p, bias_p=bias_p, N=N, K=K, Np=Np, Kp=Kp,
                tn_e=tn_e, tk_e=tk_e, tm_cap=tm_cap,
                compute_dtype=compute_dtype, vmem_limit=vmem_limit)


def fc_bn_leaky_relu_drop(x, weight=None, bias=None, gamma=None, beta=None,
                          running_mean=None, running_var=None, *, eps=1e-5,
                          params=None, compute_dtype=jnp.bfloat16,
                          tm=512, tn=512, tk=2048):
    """Eval-mode FCBNLeakyReLUdrop forward.

    x: (B, in_dim); weight: (out_dim, in_dim) [PyTorch layout]; bias &
    gamma/beta/running_mean/running_var: (out_dim,).  Returns (B, out_dim) in
    x.dtype.  Dropout(0.5) is the identity (eval mode).  Pass `params` from
    prepare_fc_bn_leaky_relu_drop to avoid re-preparing W on every call.
    """
    if params is None:
        params = prepare_fc_bn_leaky_relu_drop(
            weight, bias, gamma, beta, running_mean, running_var,
            eps=eps, compute_dtype=compute_dtype, tm=tm, tn=tn, tk=tk)

    B, K = x.shape
    assert K == params["K"], "in_dim mismatch with prepared parameters"
    N, Np, Kp = params["N"], params["Np"], params["Kp"]
    tn_e, tk_e = params["tn_e"], params["tk_e"]
    cdt = params["compute_dtype"]
    out_dtype = x.dtype

    tm_e = _pick_tile_m(B, params["tm_cap"])
    Bp = _round_up(B, tm_e)
    xp = jnp.pad(x, ((0, Bp - B), (0, Kp - K))).astype(cdt)

    m_t, n_t, k_t = Bp // tm_e, Np // tn_e, Kp // tk_e

    if k_t == 1:
        # Single K pass: no accumulator, no reduction grid axis.
        kernel = _fc_bn_lrelu_single_k_kernel
        grid = (m_t, n_t)
        in_specs = [
            pl.BlockSpec((tm_e, Kp), lambda i, j: (i, 0)),     # x tile
            pl.BlockSpec((tn_e, Kp), lambda i, j: (j, 0)),     # W tile (NT matmul)
            pl.BlockSpec((1, tn_e), lambda i, j: (0, j)),      # BN scale (resident)
            pl.BlockSpec((1, tn_e), lambda i, j: (0, j)),      # folded bias (resident)
        ]
        out_specs = pl.BlockSpec((tm_e, tn_e), lambda i, j: (i, j))
        scratch_shapes = []
        semantics = ("parallel", "parallel")
    else:
        grid = (m_t, n_t, k_t)
        in_specs = [
            pl.BlockSpec((tm_e, tk_e), lambda i, j, k: (i, k)),
            pl.BlockSpec((tn_e, tk_e), lambda i, j, k: (j, k)),
            pl.BlockSpec((1, tn_e), lambda i, j, k: (0, j)),
            pl.BlockSpec((1, tn_e), lambda i, j, k: (0, j)),
        ]
        out_specs = pl.BlockSpec((tm_e, tn_e), lambda i, j, k: (i, j))
        semantics = ("parallel", "parallel", "arbitrary")
        if jnp.dtype(out_dtype) == jnp.dtype(jnp.float32):
            # Accumulate straight into the resident f32 output block.
            kernel = _fc_bn_lrelu_multi_k_f32out_kernel
            scratch_shapes = []
        else:
            kernel = _fc_bn_lrelu_multi_k_scratch_kernel
            scratch_shapes = [pltpu.VMEM((tm_e, tn_e), jnp.float32)]

    out = pl.pallas_call(
        kernel,
        out_shape=jax.ShapeDtypeStruct((Bp, Np), out_dtype),
        grid_spec=pltpu.PrefetchScalarGridSpec(
            num_scalar_prefetch=0,
            grid=grid,
            in_specs=in_specs,
            out_specs=out_specs,
            scratch_shapes=scratch_shapes,
        ),
        compiler_params=pltpu.CompilerParams(
            dimension_semantics=semantics,
            vmem_limit_bytes=int(params["vmem_limit"]),
        ),
    )(xp, params["wp"], params["scale_p"], params["bias_p"])

    return out[:B, :N]


# --------------------------------------------------------------------------- #
# Reference + self-test
# --------------------------------------------------------------------------- #
def _reference(x, weight, bias, gamma, beta, running_mean, running_var, eps=1e-5):
    y = x @ weight.T + bias
    y = (y - running_mean) / jnp.sqrt(running_var + eps) * gamma + beta
    return jnp.where(y >= 0, y, 0.2 * y)   # dropout = identity (eval mode)


if __name__ == "__main__":
    key = jax.random.PRNGKey(0)

    def make_params(k, B, in_dim, out_dim):
        kx, kw, kb, kg, kbe, km, kv = jax.random.split(k, 7)
        bound = 1.0 / (in_dim ** 0.5)
        x = jax.random.normal(kx, (B, in_dim), jnp.float32)
        weight = jax.random.uniform(kw, (out_dim, in_dim), jnp.float32, -bound, bound)
        bias = jax.random.uniform(kb, (out_dim,), jnp.float32, -bound, bound)
        gamma = 1.0 + 0.1 * jax.random.normal(kg, (out_dim,), jnp.float32)
        beta = 0.1 * jax.random.normal(kbe, (out_dim,), jnp.float32)
        running_mean = 0.1 * jax.random.normal(km, (out_dim,), jnp.float32)
        running_var = jax.random.uniform(kv, (out_dim,), jnp.float32, 0.5, 1.5)
        return x, weight, bias, gamma, beta, running_mean, running_var

    k1, k2, k3 = jax.random.split(key, 3)

    # Case 1: module-sized toy shape (batch=8, in_dim=32, out_dim=64), default
    # bf16 compute, prepared-params path (weight padded/cast once, reusable).
    x1, w1, b1, g1, be1, rm1, rv1 = make_params(k1, 8, 32, 64)
    prep1 = prepare_fc_bn_leaky_relu_drop(w1, b1, g1, be1, rm1, rv1)
    y1 = fc_bn_leaky_relu_drop(x1, params=prep1)
    jax.block_until_ready(y1)
    assert y1.shape == (8, 64)
    x1b = x1.astype(jnp.bfloat16).astype(jnp.float32)
    w1b = w1.astype(jnp.bfloat16).astype(jnp.float32)
    ref1 = _reference(x1b, w1b, b1, g1, be1, rm1, rv1)
    assert jnp.allclose(y1, ref1, atol=2e-2, rtol=2e-2), "case 1 mismatch"

    # Case 2: f32 compute, multi-tile (M, N, K) grid exercising padding and the
    # in-place f32 output accumulation (grid = (3, 1, 3)).
    p2 = make_params(k2, 24, 640, 192)
    y2 = fc_bn_leaky_relu_drop(*p2, compute_dtype=jnp.float32, tm=8, tn=256, tk=256)
    jax.block_until_ready(y2)
    assert y2.shape == (24, 192)
    assert jnp.allclose(y2, _reference(*p2), atol=1e-3, rtol=1e-3), "case 2 mismatch"

    # Case 3: bf16 activations/output, multi-K path with the f32 VMEM
    # accumulator scratch (grid = (2, 1, 3)).
    x3, w3, b3, g3, be3, rm3, rv3 = make_params(k3, 16, 640, 192)
    y3 = fc_bn_leaky_relu_drop(x3.astype(jnp.bfloat16), w3, b3, g3, be3, rm3, rv3,
                               tm=8, tn=256, tk=256)
    jax.block_until_ready(y3)
    assert y3.shape == (16, 192) and y3.dtype == jnp.bfloat16
    x3b = x3.astype(jnp.bfloat16).astype(jnp.float32)
    w3b = w3.astype(jnp.bfloat16).astype(jnp.float32)
    ref3 = _reference(x3b, w3b, b3, g3, be3, rm3, rv3)
    assert jnp.allclose(y3.astype(jnp.float32), ref3, atol=5e-2, rtol=5e-2), \
        "case 3 mismatch"

    print("KERNEL_OK")
</pallas_src>

<mosaic_0001>
module attributes {stable_mosaic.version = 11 : i64} {
  func.func @_fc_bn_lrelu_single_k_kernel(%arg0: i32, %arg1: i32, %arg2: memref<8x128xbf16, #tpu.memory_space<vmem>>, %arg3: memref<128x128xbf16, #tpu.memory_space<vmem>>, %arg4: memref<1x128xf32, #tpu.memory_space<vmem>>, %arg5: memref<1x128xf32, #tpu.memory_space<vmem>>, %arg6: memref<8x128xf32, #tpu.memory_space<vmem>>) attributes {dimension_semantics = [#tpu.dimension_semantics<parallel>, #tpu.dimension_semantics<parallel>], iteration_bounds = array<i64: 1, 1>, scalar_prefetch = 0 : i64, scratch_operands = 0 : i64, tpu.core_type = #tpu.core_type<tc>, window_params = [{transform_indices = @transform_0, window_bounds = array<i64: 8, 128>}, {transform_indices = @transform_1, window_bounds = array<i64: 128, 128>}, {transform_indices = @transform_2, window_bounds = array<i64: 1, 128>}, {transform_indices = @transform_3, window_bounds = array<i64: 1, 128>}, {transform_indices = @transform_4, window_bounds = array<i64: 8, 128>}]} {
    %c0 = arith.constant 0 : index
    %c0_0 = arith.constant 0 : index
    %0 = vector.load %arg2[%c0, %c0_0] : memref<8x128xbf16, #tpu.memory_space<vmem>>, vector<8x128xbf16>
    %c0_1 = arith.constant 0 : index
    %c0_2 = arith.constant 0 : index
    %1 = vector.load %arg3[%c0_1, %c0_2] : memref<128x128xbf16, #tpu.memory_space<vmem>>, vector<128x128xbf16>
    %cst = arith.constant dense<0.000000e+00> : vector<8x128xf32>
    %2 = tpu.matmul %0, %1, %cst {dimension_numbers = #tpu.dot_dimension_numbers<[1], [1], [0], [0], [0, 0, 1, 0], [], []>} : vector<8x128xbf16>, vector<128x128xbf16>, vector<8x128xf32> -> vector<8x128xf32>
    %c0_3 = arith.constant 0 : index
    %c0_4 = arith.constant 0 : index
    %3 = vector.load %arg4[%c0_3, %c0_4] : memref<1x128xf32, #tpu.memory_space<vmem>>, vector<1x128xf32>
    %4 = vector.broadcast %3 : vector<1x128xf32> to vector<8x128xf32>
    %5 = arith.mulf %2, %4 : vector<8x128xf32>
    %c0_5 = arith.constant 0 : index
    %c0_6 = arith.constant 0 : index
    %6 = vector.load %arg5[%c0_5, %c0_6] : memref<1x128xf32, #tpu.memory_space<vmem>>, vector<1x128xf32>
    %7 = vector.broadcast %6 : vector<1x128xf32> to vector<8x128xf32>
    %8 = arith.addf %5, %7 : vector<8x128xf32>
    %cst_7 = arith.constant 0.000000e+00 : f32
    %9 = vector.broadcast %cst_7 : f32 to vector<8x128xf32>
    %10 = arith.cmpf oge, %8, %9 : vector<8x128xf32>
    %cst_8 = arith.constant 2.000000e-01 : f32
    %11 = vector.broadcast %cst_8 : f32 to vector<8x128xf32>
    %12 = arith.mulf %11, %8 : vector<8x128xf32>
    %13 = arith.select %10, %8, %12 : vector<8x128xi1>, vector<8x128xf32>
    %c0_9 = arith.constant 0 : index
    %c0_10 = arith.constant 0 : index
    %14 = vector.load %arg6[%c0_9, %c0_10] : memref<8x128xf32, #tpu.memory_space<vmem>>, vector<8x128xf32>
    tpu.vector_store %arg6[%c0_9, %c0_10], %13 {strides = array<i32>} : memref<8x128xf32, #tpu.memory_space<vmem>>, vector<8x128xf32>,
    return
  }
  func.func @transform_0(%arg0: i32, %arg1: i32) -> (i32, i32) {
    %c0_i32 = arith.constant 0 : i32
    %c0_i32_0 = arith.constant 0 : i32
    return %arg0, %c0_i32 : i32, i32
  }
  func.func @transform_1(%arg0: i32, %arg1: i32) -> (i32, i32) {
    %c0_i32 = arith.constant 0 : i32
    %c0_i32_0 = arith.constant 0 : i32
    return %arg1, %c0_i32 : i32, i32
  }
  func.func @transform_2(%arg0: i32, %arg1: i32) -> (i32, i32) {
    %c0_i32 = arith.constant 0 : i32
    %c0_i32_0 = arith.constant 0 : i32
    return %c0_i32, %arg1 : i32, i32
  }
  func.func @transform_3(%arg0: i32, %arg1: i32) -> (i32, i32) {
    %c0_i32 = arith.constant 0 : i32
    %c0_i32_0 = arith.constant 0 : i32
    return %c0_i32, %arg1 : i32, i32
  }
  func.func @transform_4(%arg0: i32, %arg1: i32) -> (i32, i32) {
    %c0_i32 = arith.constant 0 : i32
    return %arg0, %arg1 : i32, i32
  }
}

</mosaic_0001>

<bundles_post_ra>
// kernel: tpu_custom_call.1
= control target key start
LH: loop header
LB: loop body
LE: loop exit
PB: predicated region body
PF: predicated region fallthrough
CT: control target
= control target key end

     0   :  { %9 = vsyncpa [#allocation3], 0  ;;  %s393_s0 = inlined_call_operand.hbm [shape: bf16[8,128], index: 0, kind: input, shape index: {}]   ;;  %s394_s1 = inlined_call_operand.hbm [shape: bf16[128,128], index: 1, kind: input, shape index: {}]   ;;  %s395_s2 = inlined_call_operand.vmem [shape: f32[1,128], index: 2, kind: input, shape index: {}]   ;;  %s396_s3 = inlined_call_operand.vmem [shape: f32[1,128], index: 3, kind: input, shape index: {}]   ;;  %s397_s4 = inlined_call_operand.hbm [shape: f32[8,128], index: 4, kind: output, shape index: {}]  }
   0x1   :  { %10 = vsyncpa [#allocation6], 0 }
   0x2   :  { %11 = vsyncpa [#allocation4], 0  ;;  %s312_s15 = smov [#allocation2]   ;;  %s313_s17 = smov [#allocation5]  }
   0x3   :  { %s18_s16 = sshll.u32 %s312_s15, 4  ;;  %s27_s18 = sshll.u32 %s313_s17, 4  ;;  %s19_s16 = int_to_ptr.vmem [resolvable:$true] %s18_s16  ;;  %s344_s18 = int_to_ptr.vmem [resolvable:$true] %s27_s18 }
   0x4   :  { %s240_s21 = scalar_lea.hbm %s393_s0, 64 }
   0x5   :  { %p241_p0 = scmp.ne.s32.totalorder %s393_s0, %s240_s21  ;;  %p244_p1 = scmp.lt.u32.totalorder %s240_s21, %s393_s0 }
   0x7   :  { %p246_p2 = pnand %p244_p1, %p241_p0 }
   0x9   :  { %249 = shalt.err (!%p246_p2)
}
   0xa   :  { %s250_s26 = scalar_lea.vmem %s19_s16, 64  ;;  %p255_p4 = scmp.lt.s32.totalorder %s19_s16, %s19_s16 }
   0xb   :  { %p251_p3 = scmp.ne.s32.totalorder %s19_s16, %s250_s26  ;;  %p256_p5 = scmp.lt.s32.totalorder %s250_s26, %s250_s26 }
   0xd   :  { %p257_p6 = por %p256_p5, %p255_p4 }
   0xf   :  { %p258_p7 = pnand %p257_p6, %p251_p3 }
  0x11   :  { %261 = shalt.err (!%p258_p7)
}
  0x12   :  { %21 = dma.hbm_to_vmem [thread:$0]  %s393_s0, 64, %s19_s16, [#allocation3]  }
  0x13   :  { %s262_s5 = scalar_lea.hbm %s394_s1, 1024 }
  0x14   :  { %p263_p8 = scmp.ne.s32.totalorder %s394_s1, %s262_s5  ;;  %p266_p9 = scmp.lt.u32.totalorder %s262_s5, %s394_s1 }
  0x16   :  { %p268_p10 = pnand %p266_p9, %p263_p8 }
  0x18   :  { %271 = shalt.err (!%p268_p10)
}
  0x19   :  { %s272_s10 = scalar_lea.vmem %s344_s18, 1024  ;;  %p277_p12 = scmp.lt.s32.totalorder %s344_s18, %s344_s18 }
  0x1a   :  { %p273_p11 = scmp.ne.s32.totalorder %s344_s18, %s272_s10  ;;  %p278_p13 = scmp.lt.s32.totalorder %s272_s10, %s272_s10 }
  0x1c   :  { %p279_p0 = por %p278_p13, %p277_p12 }
  0x1e   :  { %p280_p1 = pnand %p279_p0, %p273_p11 }
  0x20   :  { %283 = shalt.err (!%p280_p1)
}
  0x21   :  { %s314_s0 = smov 64   ;;  %s315_s11 = smov 4  }
  0x22   :  { %33 = dma.hbm_to_vmem [thread:$0]  %s394_s1, 1024, %s344_s18, [#allocation6], %s314_s0, %s314_s0, %s315_s11  }
  0x23   :  { %306 = dma.done.wait [#allocation3], 64  }
  0x24   :  { %307 = vsyncadd [#allocation3], 4294967232 }
  0x25   :  { %308 = dma.done.wait [#allocation6], 1024  }
  0x26   :  { %309 = vsyncadd [#allocation6], 4294966272  ;;  %v316_v0 = vmov 0.0   ;;  %vm317_vm0 = vmmov 0   ;;  %v232_v1 = vld [vmem:[#allocation5] sm:$0xff]   ;;  %v233_v2 = vld [vmem:[#allocation5 + $0x8] sm:$0xff]  }
  0x27   :  { %205 = vmatprep.subr.bf16.mxu0 %v316_v0  ;;  %221 = vmatprep.mubr.msk.bf16.mxu0 %vm317_vm0, %v316_v0  ;;  %v234_v3 = vld [vmem:[#allocation5 + $0x10] sm:$0xff]   ;;  %v235_v4 = vld [vmem:[#allocation5 + $0x18] sm:$0xff]   ;;  %v236_v5 = vld [vmem:[#allocation5 + $0x20] sm:$0xff]   ;;  %s318_s17 = smov [#allocation7]  }
  0x28   :  { %206 = vmatpush3.bf16.xpose.msra.mxu0 %v232_v1  ;;  %v237_v6 = vld [vmem:[#allocation5 + $0x28] sm:$0xff]   ;;  %v238_v7 = vld [vmem:[#allocation5 + $0x30] sm:$0xff]   ;;  %v239_v8 = vld [vmem:[#allocation5 + $0x38] sm:$0xff]   ;;  %s176_s18 = sshll.u32 %s318_s17, 4  ;;  %s177_s18 = int_to_ptr.vmem [resolvable:$true] %s176_s18 }
  0x29   :  { %207 = vmatprep.subr.bf16.mxu0 %v316_v0  ;;  %v45_v9 = vld [vmem:[#allocation2] sm:$0xf]  ;;  %s284_s19 = scalar_lea.vmem %s177_s18, 128  ;;  %p289_p3 = scmp.lt.s32.totalorder %s177_s18, %s177_s18 }
  0x2a   :  { %v194_v10 = vld [vmem:[%s395_s2] ss:$0 sm:$0xff]  ;;  %p285_p2 = scmp.ne.s32.totalorder %s177_s18, %s284_s19  ;;  %p290_p4 = scmp.lt.s32.totalorder %s284_s19, %s284_s19 }
  0x2b   :  { %v195_v12 = vld [vmem:[%s396_s3] ss:$0 sm:$0xff] }
  0x2c   :  { %p291_p5 = por %p290_p4, %p289_p3 }
  0x2e   :  { %p292_p6 = pnand %p291_p5, %p285_p2 }
  0x30   :  { %208 = vmatpush3.bf16.xpose.msra.mxu0 %v233_v2 }
  0x31   :  { %209 = vmatprep.subr.bf16.mxu0 %v316_v0 }
  0x38   :  { %210 = vmatpush3.bf16.xpose.msra.mxu0 %v234_v3 }
  0x39   :  { %211 = vmatprep.subr.bf16.mxu0 %v316_v0 }
  0x40   :  { %212 = vmatpush3.bf16.xpose.msra.mxu0 %v235_v4 }
  0x41   :  { %213 = vmatprep.subr.bf16.mxu0 %v316_v0 }
  0x48   :  { %214 = vmatpush3.bf16.xpose.msra.mxu0 %v236_v5 }
  0x49   :  { %215 = vmatprep.subr.bf16.mxu0 %v316_v0 }
  0x50   :  { %216 = vmatpush3.bf16.xpose.msra.mxu0 %v237_v6 }
  0x51   :  { %217 = vmatprep.subr.bf16.mxu0 %v316_v0 }
  0x58   :  { %218 = vmatpush3.bf16.xpose.msra.mxu0 %v238_v7 }
  0x59   :  { %219 = vmatprep.subr.bf16.mxu0 %v316_v0 }
  0x60   :  { %220 = vmatpush3.bf16.xpose.msra.mxu0 %v239_v8 }
  0x67   :  { %222 = vmatmul.mubr.bf16.vlgmr.msra.gmra.mrb[0].mxu0 %v45_v9 }
 0x13a   :  { %v144_v11 = vpop.f32.mrb[0].mxu0 }
 0x13b   :  { %v157_v13 = vmul.f32 %v194_v10, %v144_v11  ;;  %v223_v14 = vpop.f32.mrb[1].mxu0 }
 0x13c   :  { %v147_v15 = vpop.f32.mrb[2].mxu0 }
 0x13d   :  { %v165_v16 = vadd.f32 %v195_v12, %v157_v13  ;;  %v224_v17 = vpop.f32.mrb[3].mxu0 }
 0x13f   :  { %v167_v18 = vmul.f32 0.2, %v165_v16  ;;  %vm166_vm1 = vcmp.ge.f32.partialorder %v165_v16, 0.0 }
 0x141   :  { %v168_v19 = vsel %vm166_vm1, %v165_v16, %v167_v18 }
 0x142   :  { %169 = vst [vmem:[#allocation7] sm:$0xff] %v168_v19 }
 0x143   :  { %295 = shalt.err (!%p292_p6)
}
 0x144   :  { %s296_s20 = scalar_lea.hbm %s397_s4, 128 }
 0x145   :  { %p297_p7 = scmp.ne.s32.totalorder %s397_s4, %s296_s20  ;;  %p300_p8 = scmp.lt.u32.totalorder %s296_s20, %s397_s4 }
 0x147   :  { %p302_p9 = pnand %p300_p8, %p297_p7 }
 0x149   :  { %305 = shalt.err (!%p302_p9)
}
 0x14a   :  { %179 = dma.vmem_to_hbm [thread:$0]  %s177_s18, 128, %s397_s4, [#allocation4]  }
 0x14b   :  { %310 = dma.done.wait [#allocation4], 128  }
 0x14c   :  { %311 = vsyncadd [#allocation4], 4294967168 }
 0x14d   :  { %183 = vsyncpa [#allocation3], 1 }
 0x14e   :  { %184 = vsyncpa [#allocation6], 1 }
 0x14f   :  { %185 = vsyncpa [#allocation4], 1 }

</bundles_post_ra>
